<compile_context>
chip_gen: v7x
topology: tpu7x:2x2x1
jax: 0.10.0
libtpu: 0.0.40
codegen_flags: <defaults>
</compile_context>

<pallas_src>
import functools

import jax
import jax.numpy as jnp
from jax.experimental import pallas as pl
from jax.experimental.pallas import tpu as pltpu


def _gcn_kernel(two_layered, *refs):
    """One grid step: GROUP graphs batched via a block-diagonal Ahat.

    x_ref   : (GROUP*N, V*D_in)   bf16   (Id mean over V folded into w1_ref)
    ahat_ref: (GROUP*N, GROUP*N)  bf16   block-diagonal normalized adjacency
    w1_ref  : (V*D_in, EMB)       bf16   tile(W1 * 1/V, (V, 1))
    b_ref   : (1 or 2, EMB)       f32
    w2_ref  : (EMB, EMB)          bf16   (only when two_layered)
    o_ref   : (GROUP*N, EMB)      f32
    """
    if two_layered:
        x_ref, ahat_ref, w1_ref, b_ref, w2_ref, o_ref = refs
    else:
        x_ref, ahat_ref, w1_ref, b_ref, o_ref = refs
        w2_ref = None

    ahat = ahat_ref[...]                               # bf16, pre-cast in wrapper
    b = b_ref[...]                                     # f32

    # GCNConv layer 1: the summarizer's sum/mean over V happens inside this
    # K = V*D_in lane-dense contraction (1/V pre-folded into w1_ref).
    h = jnp.dot(x_ref[...], w1_ref[...], preferred_element_type=jnp.float32)
    h = jnp.dot(ahat, h.astype(jnp.bfloat16), preferred_element_type=jnp.float32)
    h = jnp.maximum(h + b[0:1, :], 0.0)                # bias/ReLU kept in f32

    if two_layered:
        # GCNConv layer 2.
        h = jnp.dot(h.astype(jnp.bfloat16), w2_ref[...],
                    preferred_element_type=jnp.float32)
        h = jnp.dot(ahat, h.astype(jnp.bfloat16), preferred_element_type=jnp.float32)
        h = jnp.maximum(h + b[1:2, :], 0.0)

    o_ref[...] = h.astype(o_ref.dtype)


def build_normalized_adj(edge_index, num_nodes):
    """Dense Ahat = D^{-1/2} (A + I) D^{-1/2} (PyG GCNConv default normalization),
    built with one_hot matmuls (MXU-friendly) instead of a serial scatter."""
    src, tgt = edge_index[0], edge_index[1]
    loop = jnp.arange(num_nodes, dtype=edge_index.dtype)
    src = jnp.concatenate([src, loop])
    tgt = jnp.concatenate([tgt, loop])
    src_oh = jax.nn.one_hot(src, num_nodes, dtype=jnp.float32)      # (E', N)
    tgt_oh = jax.nn.one_hot(tgt, num_nodes, dtype=jnp.float32)      # (E', N)
    deg = tgt_oh.sum(axis=0)                                        # in-degree incl. self-loop
    dis = jnp.where(deg > 0, jax.lax.rsqrt(deg), 0.0)               # D^{-1/2}
    norm = (src_oh @ dis) * (tgt_oh @ dis)                          # per-edge weight (no gathers)
    ahat = tgt_oh.T @ (norm[:, None] * src_oh)                      # out[i,j] = sum_{tgt=i,src=j} norm
    return ahat


def gcn_forward(x, edge_index, w1, b1, w2=None, b2=None, *, two_layered=True, group=None):
    """x: [B, N, V, D_in] f32, edge_index: [B, 2, E] int32  ->  [B, N, EMB] f32."""
    bsz, n, v, d_in = x.shape
    emb = w1.shape[1]
    if group is None:
        # 2 balanced grid steps when possible (shards across v7x's 2 TensorCores);
        # a single step (group = B) is equally fine on 1-TC chips (v5e/v6e).
        group = bsz // 2 if (bsz >= 2 and bsz % 2 == 0) else bsz
    assert bsz % group == 0, "batch must be a multiple of the per-step group"
    n_groups = bsz // group
    gn = group * n

    # Per-graph normalized adjacency (plain JAX prologue).
    ahat = jax.vmap(build_normalized_adj, in_axes=(0, None))(edge_index, n)   # (B, N, N)

    # Block-diagonal Ahat per grid step, pre-cast to bf16 (halves its DMA bytes).
    ag = ahat.reshape(n_groups, group, n, n)
    eye_g = jnp.eye(group, dtype=ahat.dtype)
    ahat_bd = jnp.einsum('hgij,gk->hgikj', ag, eye_g).reshape(n_groups, gn, gn)
    ahat_bd = ahat_bd.astype(jnp.bfloat16)

    # Fold the Id mean's 1/V into W1 and pre-tile over V so the summarizer reduction
    # is absorbed into one lane-dense K = V*D_in contraction.
    w1t = jnp.tile(w1 * (1.0 / v), (v, 1)).astype(jnp.bfloat16)               # (V*D_in, EMB)
    w2b = w2.astype(jnp.bfloat16) if two_layered else None
    biases = (jnp.stack([b1, b2], axis=0) if two_layered
              else b1.reshape(1, emb)).astype(jnp.float32)

    # Wrapper-side flatten + cast (no in-kernel VMEM copy): (n_groups, GROUP*N, V*D_in).
    xg = x.reshape(n_groups, gn, v * d_in).astype(jnp.bfloat16)

    in_specs = [
        pl.BlockSpec((None, gn, v * d_in), lambda i: (i, 0, 0)),   # x (bf16)
        pl.BlockSpec((None, gn, gn), lambda i: (i, 0, 0)),         # block-diag Ahat (bf16)
        pl.BlockSpec((v * d_in, emb), lambda i: (0, 0)),           # tiled/scaled W1
        pl.BlockSpec(biases.shape, lambda i: (0, 0)),              # biases
    ]
    operands = [xg, ahat_bd, w1t, biases]
    if two_layered:
        in_specs.append(pl.BlockSpec((emb, emb), lambda i: (0, 0)))  # W2
        operands.append(w2b)

    # Re-derived VMEM budget: double-buffered per-step blocks + resident weights,
    # 2x slack, clamped to v7x's 64 MiB physical VMEM.
    blk_bytes = (
        2 * gn * (v * d_in) * 2        # x blocks (bf16, double-buffered)
        + 2 * gn * gn * 2              # Ahat blocks (bf16, double-buffered)
        + 2 * gn * emb * 4             # output blocks (f32, double-buffered)
        + (v * d_in) * emb * 2 + emb * emb * 2 + 2 * emb * 4       # resident weights/bias
    )
    vmem_limit = int(min(64 << 20, max(4 << 20, 2 * blk_bytes)))

    kernel = functools.partial(_gcn_kernel, two_layered)

    out = pl.pallas_call(
        kernel,
        out_shape=jax.ShapeDtypeStruct((n_groups, gn, emb), jnp.float32),
        grid=(n_groups,),
        in_specs=in_specs,
        out_specs=pl.BlockSpec((None, gn, emb), lambda i: (i, 0, 0)),
        compiler_params=pltpu.CompilerParams(
            dimension_semantics=("parallel",),       # shards grid steps across v7x TCs
            vmem_limit_bytes=vmem_limit,
        ),
    )(*operands)

    # (n_groups, GROUP*N, EMB) -> (B, N, EMB); graph-major row ordering is preserved.
    return out.reshape(bsz, n, emb)


def _reference_f32(x, edge_index, w1, b1, w2, b2, two_layered=True):
    """Pure-JAX f32 reference of the same forward pass (module semantics)."""
    _, n, _, _ = x.shape
    ahat = jax.vmap(build_normalized_adj, in_axes=(0, None))(edge_index, n)
    inner = x.mean(axis=2)                                       # Id.forward (DIRE)
    h = jnp.einsum('bnm,bmd->bnd', ahat, inner @ w1) + b1
    h = jnp.maximum(h, 0.0)
    if two_layered:
        h = jnp.einsum('bnm,bmd->bnd', ahat, h @ w2) + b2
        h = jnp.maximum(h, 0.0)
    return h


def _reference_bf16(x, edge_index, w1, b1, w2, b2, two_layered=True):
    """Per-graph reference mirroring the kernel's bf16-in / f32-accumulate math."""
    bsz, n, v, d_in = x.shape
    ahat = jax.vmap(build_normalized_adj, in_axes=(0, None))(edge_index, n)
    w1t = jnp.tile(w1 * (1.0 / v), (v, 1)).astype(jnp.bfloat16)
    w2b = w2.astype(jnp.bfloat16) if two_layered else None
    outs = []
    for g in range(bsz):
        ag = ahat[g].astype(jnp.bfloat16)
        xf = x[g].reshape(n, v * d_in).astype(jnp.bfloat16)
        h = jnp.dot(xf, w1t, preferred_element_type=jnp.float32)
        h = jnp.dot(ag, h.astype(jnp.bfloat16), preferred_element_type=jnp.float32)
        h = jnp.maximum(h + b1, 0.0)
        if two_layered:
            h = jnp.dot(h.astype(jnp.bfloat16), w2b, preferred_element_type=jnp.float32)
            h = jnp.dot(ag, h.astype(jnp.bfloat16), preferred_element_type=jnp.float32)
            h = jnp.maximum(h + b2, 0.0)
        outs.append(h)
    return jnp.stack(outs, axis=0)


if __name__ == "__main__":
    # Small deterministic problem: a batch of 8 graphs, 8 nodes each, 4 variables per
    # node, DIRE_OUTPUT_SIZE = 32, embedding_size = 32, two-layered GCN.
    # V * D_IN = 128 (lane-dense K for the fused summarizer+matmul).
    B, N, V, D_IN, EMB = 8, 8, 4, 32, 32
    TWO_LAYERED = True

    key = jax.random.PRNGKey(0)
    kx, kw1, kw2 = jax.random.split(key, 3)

    x = jax.random.normal(kx, (B, N, V, D_IN), dtype=jnp.float32)

    # Deterministic "glorot-ish" weights; zero biases (GCNConv default).
    w1 = jax.random.normal(kw1, (D_IN, EMB), dtype=jnp.float32) * (1.0 / jnp.sqrt(D_IN))
    b1 = jnp.zeros((EMB,), jnp.float32)
    w2 = jax.random.normal(kw2, (EMB, EMB), dtype=jnp.float32) * (1.0 / jnp.sqrt(EMB))
    b2 = jnp.zeros((EMB,), jnp.float32)

    # Per-graph directed ring plus two graph-dependent extra edges (same E per graph).
    ring_src = jnp.arange(N, dtype=jnp.int32)
    ring_tgt = ((jnp.arange(N) + 1) % N).astype(jnp.int32)
    edge_list = []
    for g in range(B):
        extra_src = jnp.array([g % N, (g + 2) % N], dtype=jnp.int32)
        extra_tgt = jnp.array([(g + 3) % N, (g + 5) % N], dtype=jnp.int32)
        src = jnp.concatenate([ring_src, extra_src])
        tgt = jnp.concatenate([ring_tgt, extra_tgt])
        edge_list.append(jnp.stack([src, tgt], axis=0))
    edge_index = jnp.stack(edge_list, axis=0).astype(jnp.int32)   # (B, 2, N+2)

    out = gcn_forward(x, edge_index, w1, b1, w2, b2, two_layered=TWO_LAYERED)
    out = jax.block_until_ready(out)
    assert out.shape == (B, N, EMB)

    # Tight check vs. a reference using the exact same bf16/f32 math.
    ref_matched = _reference_bf16(x, edge_index, w1, b1, w2, b2, two_layered=TWO_LAYERED)
    assert jnp.allclose(out, ref_matched, atol=2e-3, rtol=2e-3)

    # Loose check vs. the full-precision module semantics (bf16 MXU inputs only).
    ref_f32 = _reference_f32(x, edge_index, w1, b1, w2, b2, two_layered=TWO_LAYERED)
    assert jnp.allclose(out, ref_f32, atol=3e-2, rtol=3e-2)

    print("KERNEL_OK")
</pallas_src>

<mosaic_0001>
module attributes {stable_mosaic.version = 11 : i64} {
  func.func @_gcn_kernel(%arg0: i32, %arg1: memref<1x32x128xbf16, #tpu.memory_space<vmem>>, %arg2: memref<1x32x32xbf16, #tpu.memory_space<vmem>>, %arg3: memref<128x32xbf16, #tpu.memory_space<vmem>>, %arg4: memref<2x32xf32, #tpu.memory_space<vmem>>, %arg5: memref<32x32xbf16, #tpu.memory_space<vmem>>, %arg6: memref<1x32x32xf32, #tpu.memory_space<vmem>>) attributes {dimension_semantics = [#tpu.dimension_semantics<parallel>], iteration_bounds = array<i64: 2>, scalar_prefetch = 0 : i64, scratch_operands = 0 : i64, tpu.core_type = #tpu.core_type<tc>, window_params = [{transform_indices = @transform_0, window_bounds = array<i64: 1, 32, 128>}, {transform_indices = @transform_1, window_bounds = array<i64: 1, 32, 32>}, {pipeline_mode = #tpu.pipeline_mode<synchronous>, transform_indices = @transform_2, window_bounds = array<i64: 128, 32>}, {pipeline_mode = #tpu.pipeline_mode<synchronous>, transform_indices = @transform_3, window_bounds = array<i64: 2, 32>}, {pipeline_mode = #tpu.pipeline_mode<synchronous>, transform_indices = @transform_4, window_bounds = array<i64: 32, 32>}, {transform_indices = @transform_5, window_bounds = array<i64: 1, 32, 32>}]} {
    %c0 = arith.constant 0 : index
    %c0_0 = arith.constant 0 : index
    %c0_1 = arith.constant 0 : index
    %0 = vector.load %arg2[%c0, %c0_0, %c0_1] : memref<1x32x32xbf16, #tpu.memory_space<vmem>>, vector<1x32x32xbf16>
    %1 = vector.shape_cast %0 : vector<1x32x32xbf16> to vector<32x32xbf16>
    %c0_2 = arith.constant 0 : index
    %c0_3 = arith.constant 0 : index
    %2 = vector.load %arg4[%c0_2, %c0_3] : memref<2x32xf32, #tpu.memory_space<vmem>>, vector<2x32xf32>
    %c0_4 = arith.constant 0 : index
    %c0_5 = arith.constant 0 : index
    %c0_6 = arith.constant 0 : index
    %3 = vector.load %arg1[%c0_4, %c0_5, %c0_6] : memref<1x32x128xbf16, #tpu.memory_space<vmem>>, vector<1x32x128xbf16>
    %4 = vector.shape_cast %3 : vector<1x32x128xbf16> to vector<32x128xbf16>
    %c0_7 = arith.constant 0 : index
    %c0_8 = arith.constant 0 : index
    %5 = vector.load %arg3[%c0_7, %c0_8] : memref<128x32xbf16, #tpu.memory_space<vmem>>, vector<128x32xbf16>
    %cst = arith.constant dense<0.000000e+00> : vector<32x32xf32>
    %6 = tpu.matmul %4, %5, %cst {dimension_numbers = #tpu.dot_dimension_numbers<[1], [0], [0], [1], [0, 0, 1, 1], [], []>} : vector<32x128xbf16>, vector<128x32xbf16>, vector<32x32xf32> -> vector<32x32xf32>
    %7 = arith.truncf %6 : vector<32x32xf32> to vector<32x32xbf16>
    %cst_9 = arith.constant dense<0.000000e+00> : vector<32x32xf32>
    %8 = tpu.matmul %1, %7, %cst_9 {dimension_numbers = #tpu.dot_dimension_numbers<[1], [0], [0], [1], [0, 0, 1, 1], [], []>} : vector<32x32xbf16>, vector<32x32xbf16>, vector<32x32xf32> -> vector<32x32xf32>
    %9 = vector.extract_strided_slice %2 {offsets = [0, 0], sizes = [1, 32], strides = [1, 1]} : vector<2x32xf32> to vector<1x32xf32>
    %10 = vector.broadcast %9 : vector<1x32xf32> to vector<32x32xf32>
    %11 = arith.addf %8, %10 : vector<32x32xf32>
    %cst_10 = arith.constant 0.000000e+00 : f32
    %12 = vector.broadcast %cst_10 : f32 to vector<32x32xf32>
    %13 = arith.maximumf %11, %12 : vector<32x32xf32>
    %14 = arith.truncf %13 : vector<32x32xf32> to vector<32x32xbf16>
    %c0_11 = arith.constant 0 : index
    %c0_12 = arith.constant 0 : index
    %15 = vector.load %arg5[%c0_11, %c0_12] : memref<32x32xbf16, #tpu.memory_space<vmem>>, vector<32x32xbf16>
    %cst_13 = arith.constant dense<0.000000e+00> : vector<32x32xf32>
    %16 = tpu.matmul %14, %15, %cst_13 {dimension_numbers = #tpu.dot_dimension_numbers<[1], [0], [0], [1], [0, 0, 1, 1], [], []>} : vector<32x32xbf16>, vector<32x32xbf16>, vector<32x32xf32> -> vector<32x32xf32>
    %17 = arith.truncf %16 : vector<32x32xf32> to vector<32x32xbf16>
    %cst_14 = arith.constant dense<0.000000e+00> : vector<32x32xf32>
    %18 = tpu.matmul %1, %17, %cst_14 {dimension_numbers = #tpu.dot_dimension_numbers<[1], [0], [0], [1], [0, 0, 1, 1], [], []>} : vector<32x32xbf16>, vector<32x32xbf16>, vector<32x32xf32> -> vector<32x32xf32>
    %19 = vector.extract_strided_slice %2 {offsets = [1, 0], sizes = [1, 32], strides = [1, 1]} : vector<2x32xf32> to vector<1x32xf32>
    %20 = vector.broadcast %19 : vector<1x32xf32> to vector<32x32xf32>
    %21 = arith.addf %18, %20 : vector<32x32xf32>
    %cst_15 = arith.constant 0.000000e+00 : f32
    %22 = vector.broadcast %cst_15 : f32 to vector<32x32xf32>
    %23 = arith.maximumf %21, %22 : vector<32x32xf32>
    %c0_16 = arith.constant 0 : index
    %c0_17 = arith.constant 0 : index
    %c0_18 = arith.constant 0 : index
    %24 = vector.load %arg6[%c0_16, %c0_17, %c0_18] : memref<1x32x32xf32, #tpu.memory_space<vmem>>, vector<1x32x32xf32>
    %25 = vector.shape_cast %24 : vector<1x32x32xf32> to vector<32x32xf32>
    %26 = vector.shape_cast %23 : vector<32x32xf32> to vector<1x32x32xf32>
    tpu.vector_store %arg6[%c0_16, %c0_17, %c0_18], %26 {strides = array<i32>} : memref<1x32x32xf32, #tpu.memory_space<vmem>>, vector<1x32x32xf32>,
    return
  }
  func.func @transform_0(%arg0: i32) -> (i32, i32, i32) {
    %c0_i32 = arith.constant 0 : i32
    %c0_i32_0 = arith.constant 0 : i32
    %c0_i32_1 = arith.constant 0 : i32
    return %arg0, %c0_i32, %c0_i32_0 : i32, i32, i32
  }
  func.func @transform_1(%arg0: i32) -> (i32, i32, i32) {
    %c0_i32 = arith.constant 0 : i32
    %c0_i32_0 = arith.constant 0 : i32
    %c0_i32_1 = arith.constant 0 : i32
    return %arg0, %c0_i32, %c0_i32_0 : i32, i32, i32
  }
  func.func @transform_2(%arg0: i32) -> (i32, i32) {
    %c0_i32 = arith.constant 0 : i32
    %c0_i32_0 = arith.constant 0 : i32
    %c0_i32_1 = arith.constant 0 : i32
    return %c0_i32, %c0_i32_0 : i32, i32
  }
  func.func @transform_3(%arg0: i32) -> (i32, i32) {
    %c0_i32 = arith.constant 0 : i32
    %c0_i32_0 = arith.constant 0 : i32
    %c0_i32_1 = arith.constant 0 : i32
    return %c0_i32, %c0_i32_0 : i32, i32
  }
  func.func @transform_4(%arg0: i32) -> (i32, i32) {
    %c0_i32 = arith.constant 0 : i32
    %c0_i32_0 = arith.constant 0 : i32
    %c0_i32_1 = arith.constant 0 : i32
    return %c0_i32, %c0_i32_0 : i32, i32
  }
  func.func @transform_5(%arg0: i32) -> (i32, i32, i32) {
    %c0_i32 = arith.constant 0 : i32
    %c0_i32_0 = arith.constant 0 : i32
    %c0_i32_1 = arith.constant 0 : i32
    return %arg0, %c0_i32, %c0_i32_0 : i32, i32, i32
  }
}

</mosaic_0001>

<bundles_post_ra>
// kernel: tpu_custom_call.1
= control target key start
LH: loop header
LB: loop body
LE: loop exit
PB: predicated region body
PF: predicated region fallthrough
CT: control target
= control target key end

     0   :  { %10 = vsyncpa [#allocation3], 0  ;;  %s1085_s0 = inlined_call_operand.vmem [shape: bf16[2,32,128], index: 0, kind: input, shape index: {}]   ;;  %s1086_s1 = inlined_call_operand.vmem [shape: bf16[2,32,32], index: 1, kind: input, shape index: {}]   ;;  %s1087_s2 = inlined_call_operand.vmem [shape: bf16[128,32], index: 2, kind: input, shape index: {}]   ;;  %s1088_s3 = inlined_call_operand.vmem [shape: f32[2,32], index: 3, kind: input, shape index: {}]   ;;  %s1089_s4 = inlined_call_operand.vmem [shape: bf16[32,32], index: 4, kind: input, shape index: {}]   ;;  %s1090_s5 = inlined_call_operand.hbm [shape: f32[2,32,32], index: 5, kind: output, shape index: {}]  }
   0x1   :  { %12 = vsyncpa [#allocation3 + $0x1], 0  ;;  %s933_s18 = smov 0   ;;  %s935_s19 = smov 0  }
   0x2   :  { %s937_s20 = smov 0   ;;  %s939_s21 = smov 0  }
   0x3 LB: > { %s954_s22 = sadd.s32 4294967295, %s898_s21   ;;  %s678_s23 = sadd.s32 4294967294, %s898_s21   ;;  %s898_s21 = sphi %s939_s21, %s1096_s21   ;;  %s894_s20 = sphi %s937_s20, %s1095_s20   ;;  %s890_s19 = sphi %s935_s19, %s1094_s19   ;;  %s886_s18 = sphi %s933_s18, %s1093_s18  }
   0x4   : > { %s958_s24 = sadd.s32 1, %s898_s21   ;;  %s140_s25 = sadd.s32 1, %s894_s20 }
   0x5   : > { %s137_s26 = ssub.s32 %s898_s21, %s958_s24  ;;  %p150_p0 = scmp.ne.s32.totalorder %s894_s20, %s890_s19 }
   0x6   : > { %p138_p1 = scmp.eq.s32.totalorder %s137_s26, 0  ;;  %p151_p2 = scmp.eq.s32.totalorder %s954_s22, 1 }
   0x7   : > { %p156_p3 = scmp.ne.s32.totalorder %s890_s19, %s886_s18  ;;  %p157_p4 = scmp.eq.s32.totalorder %s678_s23, 1 }
   0x8   : > { %s969_s27 = scalar_select %p138_p1, %s894_s20, %s140_s25  }
   0x9   : > { %p971_p5 = por %p151_p2, %p150_p0  ;;  %p975_p6 = por %p157_p4, %p156_p3 }
   0xa   : > { %p681_p7 = scmp.ge.s32.totalorder %s898_s21, 1  ;;  %p200_p8 = scmp.lt.s32.totalorder %s898_s21, 3 }
   0xc   : > { %p201_p9 = pnand %p681_p7, %p200_p8 }
   0xd   : > { %v822_v0 = vld [vmem:[%s1087_s2] sm:$0xff] (!%p201_p9)   ;;  %p233_p10 = scmp.lt.s32.totalorder (!%p201_p9), %s954_s22, 1  ;;  %v823_v1 = vld [vmem:[%s1087_s2 + $0x8] sm:$0xff] (!%p201_p9)   ;;  %v824_v2 = vld [vmem:[%s1087_s2 + $0x10] sm:$0xff] (!%p201_p9)   ;;  %vm394_vm0 = vcmask (!%p201_p9), 261120   ;;  %v380_v20 = vlaneseq (!%p201_p9)  ;;  %s230_s25 = sand.u32 (!%p201_p9), 1, %s890_s19  }
   0xe   : > { %204 = sbr.rel (%p201_p9) target bundleno = 952 (0x3b8), region = 40  ;;  %737 = vmatprep.subr.bf16.mxu0 (!%p201_p9), %v822_v0  ;;  %v825_v3 = vld [vmem:[%s1087_s2 + $0x18] sm:$0xff] (!%p201_p9)   ;;  %v826_v5 = vld [vmem:[%s1087_s2 + $0x20] sm:$0xff] (!%p201_p9)   ;;  %v827_v6 = vld [vmem:[%s1087_s2 + $0x28] sm:$0xff] (!%p201_p9)   ;;  %s682_s26 = sshll.u32 (!%p201_p9), %s230_s25, 5 }
   0xf   : > { %738 = vmatpush3.bf16.msra.mxu0 (!%p201_p9), %v822_v0  ;;  %v828_v7 = vld [vmem:[%s1087_s2 + $0x30] sm:$0xff] (!%p201_p9)   ;;  %v829_v8 = vld [vmem:[%s1087_s2 + $0x38] sm:$0xff] (!%p201_p9)   ;;  %v834_v18 = vld [vmem:[%s1089_s4] sm:$0xff] (!%p201_p9)   ;;  %v381_v21 = vshrl.u32 (!%p201_p9), %v380_v20, 7  ;;  %s232_s30 = scalar_lea.vmem (!%p201_p9), [#allocation2], %s682_s26  ;;  %s714_s7 = sshll.u32 (!%p201_p9), %s954_s22, 9 }
  0x10   : > { %739 = vmatprep.subr.bf16.mxu0 (!%p201_p9), %v823_v1  ;;  %v835_v19 = vld [vmem:[%s1089_s4 + $0x8] sm:$0xff] (!%p201_p9)   ;;  %v248_v23 = vld [vmem:[%s1088_s3] sm:$0x3] (!%p201_p9)  ;;  %s604_s6 = sshll.u32 (!%p201_p9), %s232_s30, 4  ;;  %s1039_s10 = scalar_lea.hbm (!%p201_p9), %s1090_s5, %s714_s7  ;;  %s1034_s6 = int_to_ptr.vmem [resolvable:$true] %s604_s6 }
  0x11   : > { %v382_v22 = vsub.s32 (!%p201_p9), 0, %v381_v21  ;;  %v531_v45 = vsub.s32 (!%p201_p9), 1, %v381_v21  ;;  %s836_s11 = scalar_lea.vmem (!%p201_p9), %s1034_s6, 512 }
  0x12   : > { %p837_p11 = scmp.ne.s32.totalorder (!%p201_p9), %s1034_s6, %s836_s11 }
  0x13   : > { %740 = vmatpush3.bf16.msra.mxu0 (!%p201_p9), %v823_v1  ;;  %v383_v24 = vrot.slane (!%p201_p9), %v248_v23, %v382_v22  ;;  %v532_v46 = vrot.slane (!%p201_p9), %v248_v23, %v531_v45 }
  0x14   : > { %741 = vmatprep.subr.bf16.mxu0 (!%p201_p9), %v824_v2  ;;  %p838_p12 = pnand (!%p201_p9), %p837_p11, %p971_p5 }
  0x15   : > { %s989_s9 = scalar_select %p233_p10, %s954_s22, 1 }
  0x16   : > { %s1044_s22 = scalar_lea.sflag [#allocation3], %s230_s25  ;;  %p839_p13 = pneg %p838_p12 }
  0x17   : > { %s712_s12 = sshll.u32 %s989_s9, 4  ;;  %742 = vmatpush3.bf16.msra.mxu0 %v824_v2 }
  0x18   : > { %s237_s15 = scalar_lea.vmem %s1085_s0, %s712_s12  ;;  %743 = vmatprep.subr.bf16.mxu0 %v825_v3  ;;  %s242_s13 = scalar_lea.vmem %s1086_s1, %s712_s12 }
  0x19   : > { %v830_v4 = vld [vmem:[%s237_s15] sm:$0xff]   ;;  %v831_v9 = vld [vmem:[%s237_s15 + $0x8] sm:$0xff]  }
  0x1a   : > { %753 = vmatprep.mubr.bf16.mxu0 %v830_v4  ;;  %v832_v10 = vld [vmem:[%s242_s13] sm:$0xff]   ;;  %v833_v17 = vld [vmem:[%s242_s13 + $0x8] sm:$0xff]   ;;  %s900_s13 = smov [#allocation2]  }
  0x1b   : > { %744 = vmatpush3.bf16.msra.mxu0 %v825_v3  ;;  %761 = vmatprep.mubr.msk.bf16.mxu1 %vm394_vm0, %v832_v10  ;;  %s840_s14 = sshll.u32 %s900_s13, 4  ;;  %s841_s14 = int_to_ptr.vmem [resolvable:$false] %s840_s14 }
  0x1c   : > { %745 = vmatprep.subr.bf16.mxu0 %v826_v5  ;;  %s842_s15 = scalar_lea.vmem %s841_s14, 1024  ;;  %p843_p0 = scmp.lt.s32.totalorder %s1034_s6, %s841_s14 }
  0x1d   : > { %p844_p1 = scmp.lt.s32.totalorder %s842_s15, %s836_s11 }
  0x1f   : > { %746 = vmatpush3.bf16.msra.mxu0 %v826_v5  ;;  %p845_p2 = por %p844_p1, %p843_p0 }
  0x20   : > { %747 = vmatprep.subr.bf16.mxu0 %v827_v6 }
  0x21   : > { %p846_p3 = pnand %p845_p2, %p839_p13 }
  0x23   : > { %748 = vmatpush3.bf16.msra.mxu0 %v827_v6 }
  0x24   : > { %749 = vmatprep.subr.bf16.mxu0 %v828_v7 }
  0x27   : > { %750 = vmatpush3.bf16.msra.mxu0 %v828_v7 }
  0x28   : > { %751 = vmatprep.subr.bf16.mxu0 %v829_v8 }
  0x2b   : > { %752 = vmatpush3.bf16.msra.mxu0 %v829_v8 }
  0x2e   : > { %754 = vmatmul.mubr.bf16.vlgmr.msra.gmra.mrb[0].mxu0 %v831_v9 }
 0x101   : > { %v755_v11 = vpop.f32.mrb[0].mxu0 }
 0x102   : > { %v363_v12 = vpop.f32.mrb[1].mxu0 }
 0x103   : > { %v756_v13 = vpop.f32.mrb[2].mxu0 }
 0x104   : > { %v379_v14 = vpack.c.bf16 %v756_v13, %v755_v11  ;;  %v366_v15 = vpop.f32.mrb[3].mxu0 }
 0x105   : > { %v378_v16 = vpack.c.bf16 %v366_v15, %v363_v12 }
 0x107   : > { %757 = vmatprep.subr.bf16.mxu1 %v378_v16 }
 0x108   : > { %758 = vmatpush3.bf16.msra.mxu1 %v378_v16 }
 0x109   : > { %759 = vmatprep.subr.bf16.mxu1 %v379_v14 }
 0x10c   : > { %760 = vmatpush3.bf16.msra.mxu1 %v379_v14 }
 0x10d   : > { %765 = vmatprep.subr.bf16.mxu1 %v834_v18 }
 0x10f   : > { %762 = vmatmul.mubr.msk.bf16.vlgmr.msra.gmra.mrb[0].mxu1 %vm394_vm0, %v833_v17 }
 0x110   : > { %766 = vmatpush3.bf16.msra.mxu1 %v834_v18 }
 0x111   : > { %767 = vmatprep.subr.bf16.mxu1 %v835_v19 }
 0x114   : > { %768 = vmatpush3.bf16.msra.mxu1 %v835_v19 }
 0x1e2   : > { %v763_v25 = vpop.f32.mrb[0].mxu1 }
 0x1e3   : > { %v444_v26 = vadd.f32 %v763_v25, %v383_v24  ;;  %v435_v27 = vpop.f32.mrb[1].mxu1 }
 0x1e4   : > { %v436_v28 = vadd.f32 %v435_v27, %v383_v24  ;;  %v764_v29 = vpop.f32.mrb[2].mxu1 }
 0x1e5   : > { %v447_v30 = vadd.f32 %v764_v29, %v383_v24  ;;  %v438_v31 = vpop.f32.mrb[3].mxu1  ;;  %v452_v33 = vmax.f32 %v444_v26, 0.0 }
 0x1e6   : > { %v439_v32 = vadd.f32 %v438_v31, %v383_v24  ;;  %v450_v35 = vmax.f32 %v436_v28, 0.0 }
 0x1e7   : > { %v453_v34 = vmax.f32 %v447_v30, 0.0 }
 0x1e8   : > { %v451_v36 = vmax.f32 %v439_v32, 0.0 }
 0x1e9   : > { %v455_v37 = vpack.c.bf16 %v453_v34, %v452_v33 }
 0x1ea   : > { %v454_v38 = vpack.c.bf16 %v451_v36, %v450_v35 }
 0x1ec   : > { %769 = vmatprep.mubr.msk.bf16.mxu1 %vm394_vm0, %v454_v38 }
 0x1ed   : > { %770 = vmatmul.mubr.msk.bf16.vlgmr.msra.gmra.mrb[4].mxu1 %vm394_vm0, %v455_v37 }
 0x1ee   : > { %777 = vmatprep.mubr.msk.bf16.mxu1 %vm394_vm0, %v832_v10 }
 0x2c0   : > { %v771_v39 = vpop.f32.mrb[4].mxu1 }
 0x2c1   : > { %v512_v40 = vpop.f32.mrb[5].mxu1 }
 0x2c2   : > { %v772_v41 = vpop.f32.mrb[6].mxu1 }
 0x2c3   : > { %v528_v42 = vpack.c.bf16 %v772_v41, %v771_v39  ;;  %v515_v43 = vpop.f32.mrb[7].mxu1 }
 0x2c4   : > { %v527_v44 = vpack.c.bf16 %v515_v43, %v512_v40 }
 0x2c6   : > { %773 = vmatprep.subr.bf16.mxu1 %v527_v44 }
 0x2c7   : > { %774 = vmatpush3.bf16.msra.mxu1 %v527_v44 }
 0x2c8   : > { %775 = vmatprep.subr.bf16.mxu1 %v528_v42 }
 0x2cb   : > { %776 = vmatpush3.bf16.msra.mxu1 %v528_v42 }
 0x2ce   : > { %778 = vmatmul.mubr.msk.bf16.vlgmr.msra.gmra.mrb[8].mxu1 %vm394_vm0, %v833_v17 }
 0x3a1   : > { %v779_v47 = vpop.f32.mrb[8].mxu1 }
 0x3a2   : > { %v576_v48 = vadd.f32 %v779_v47, %v532_v46  ;;  %v567_v49 = vpop.f32.mrb[9].mxu1 }
 0x3a3   : > { %v568_v50 = vadd.f32 %v567_v49, %v532_v46  ;;  %v780_v51 = vpop.f32.mrb[10].mxu1 }
 0x3a4   : > { %v584_v52 = vmax.f32 %v576_v48, 0.0  ;;  %v579_v53 = vadd.f32 %v780_v51, %v532_v46  ;;  %v570_v54 = vpop.f32.mrb[11].mxu1 }
 0x3a5   : > { %v582_v55 = vmax.f32 %v568_v50, 0.0  ;;  %v571_v56 = vadd.f32 %v570_v54, %v532_v46 }
 0x3a6   : > { %588 = vst.msk [vmem:[%s232_s30 + $0x10] sm:$0xff] %vm394_vm0, %v584_v52  ;;  %v585_v57 = vmax.f32 %v579_v53, 0.0 }
 0x3a7   : > { %586 = vst.msk [vmem:[%s232_s30] sm:$0xff] %vm394_vm0, %v582_v55  ;;  %v583_v58 = vmax.f32 %v571_v56, 0.0 }
 0x3a8   : > { %589 = vst.msk [vmem:[%s232_s30 + $0x18] sm:$0xff] %vm394_vm0, %v585_v57 }
 0x3a9   : > { %587 = vst.msk [vmem:[%s232_s30 + $0x8] sm:$0xff] %vm394_vm0, %v583_v58 }
 0x3aa   : > { %849 = shalt.err (!%p846_p3)
}
 0x3ab   : > { %s850_s12 = scalar_lea.hbm %s1039_s10, 512  ;;  %s854_s23 = scalar_lea.hbm %s1090_s5, 1024 }
 0x3ac   : > { %p851_p4 = scmp.ne.s32.totalorder %s1039_s10, %s850_s12  ;;  %p855_p9 = scmp.lt.u32.totalorder %s1039_s10, %s1090_s5 }
 0x3ad   : > { %p856_p10 = scmp.lt.u32.totalorder %s854_s23, %s850_s12  ;;  %p858_p12 = scmp.lt.u32.totalorder %s850_s12, %s1039_s10 }
 0x3ae   : > { %p852_p7 = pnand %p851_p4, %p971_p5 }
 0x3af   : > { %p857_p11 = por %p856_p10, %p855_p9 }
 0x3b0   : > { %p853_p8 = pneg %p852_p7 }
 0x3b1   : > { %p859_p13 = por %p858_p12, %p857_p11 }
 0x3b3   : > { %p860_p0 = pnand %p859_p13, %p853_p8 }
 0x3b5   : > { %863 = shalt.err (!%p860_p0)
}
 0x3b6   : > { %s901_s30 = smov 128   ;;  %s902_s7 = smov 8  }
 0x3b7   : > { %781 = dma.vmem_to_hbm [thread:$0]  (%p971_p5), %s1034_s6, 512, %s1039_s10, %s1044_s22, %s901_s30, %s901_s30, %s902_s7  }
 0x3b8 PF: > { %p787_p1 = scmp.ge.s32.totalorder %s898_s21, 2  ;;  %s619_s8 = sand.u32 1, %s886_s18  }
 0x3b9   : > { %s620_s9 = scalar_lea.sflag [#allocation3], %s619_s8 }
 0x3ba   : > { %p784_p2 = pnand %p787_p1, %p975_p6 }
 0x3bc   : > { %881 = dma.done.wait (!%p784_p2), %s620_s9, 512  }
 0x3bd   : > { %883 = vsyncadd (!%p784_p2), %s620_s9, 4294966784  ;;  %p15_p3 = scmp.ge.s32.totalorder %s958_s24, 4   ;;  %s1093_s18 = smov %s890_s19 }
 0x3be   : > { %s1094_s19 = smov %s894_s20  ;;  %s1095_s20 = smov %s969_s27 }
 0x3bf   : > { %s1096_s21 = smov %s958_s24  ;;  %17 = sbr.rel (!%p15_p3) target bundleno = 3 (0x3), region = 78 }
 0x3c6   :  { %625 = vsyncpa [#allocation3], 1 }
 0x3c7   :  { %627 = vsyncpa [#allocation3 + $0x1], 1 }

</bundles_post_ra>
